<compile_context>
chip_gen: v7x
topology: tpu7x:2x2x1
jax: 0.10.0
libtpu: 0.0.40
codegen_flags: <defaults>
</compile_context>

<pallas_src>
import jax
import jax.numpy as jnp
from jax.experimental import pallas as pl
from jax.experimental.pallas import tpu as pltpu


# ---------------------------------------------------------------------------
# Main SPE kernel.  One grid step processes a block of `gpb` graphs.
#   e   = V[i,:] * V[j,:]  flattened to [n*n, D]
#   pre = e @ G                          (single MXU matmul, lane-dense)
#   h1  = relu(pre + b1)                 (stays flat [n*n, Hphi])
#   s   = S @ h1                         (single MXU matmul: neighbor sum)
#   out = s @ W2_pad + b2_pad            (lane-dense, Dpad = 128 multiple)
# ---------------------------------------------------------------------------
def spe_kernel(v_ref, g_ref, s_ref, bp1_ref, wp2_ref, bp2_ref, o_ref):
    # v_ref : [gpb*n, D]      eigenvector rows of the graphs in this block
    # g_ref : [gpb, D, Hphi]  per-graph G = Z[b] @ phi_w1 (hoisted in wrapper)
    # s_ref : [gpb, n, n*n]   row-selector adjacency: S[i, i*n+j] = A[i,j]
    # bp1   : [1, Hphi]   wp2: [Hphi, Dpad]   bp2: [1, Dpad]
    # o_ref : [gpb*n, Dpad]   lane-dense (Dpad multiple of 128), sliced outside
    gpb = g_ref.shape[0]
    n = s_ref.shape[1]
    d = v_ref.shape[1]

    bp1 = bp1_ref[...]                                   # [1, Hphi]
    bp2 = bp2_ref[...]                                   # [1, Dpad]
    wp2 = wp2_ref[...].astype(jnp.bfloat16)              # [Hphi, Dpad]

    # TODO(synk): for large n (n*n*Hphi*4B approaching v7x's 64 MiB VMEM) the
    # per-graph [n*n, Hphi] intermediate should additionally be tiled along i.
    for gi in range(gpb):                                # static, capped unroll
        vg = v_ref[pl.ds(gi * n, n), :]                  # [n, D] (static slice)
        gg = g_ref[gi].astype(jnp.bfloat16)              # [D, Hphi]
        sg = s_ref[gi].astype(jnp.bfloat16)              # [n, n*n]

        # e[i*n + j, d] = V[i, d] * V[j, d]
        e = (vg[:, None, :] * vg[None, :, :]).reshape(n * n, d)      # [n*n, D]
        pre = jnp.dot(e.astype(jnp.bfloat16), gg,
                      preferred_element_type=jnp.float32)            # [n*n, Hphi]
        h1 = jnp.maximum(pre + bp1, 0.0)                             # [n*n, Hphi]

        # Neighbor sum (in-neighbors + self loop) as one MXU matmul.
        s = jnp.dot(sg, h1.astype(jnp.bfloat16),
                    preferred_element_type=jnp.float32)              # [n, Hphi]

        out = jnp.dot(s.astype(jnp.bfloat16), wp2,
                      preferred_element_type=jnp.float32) + bp2      # [n, Dpad]
        o_ref[pl.ds(gi * n, n), :] = out.astype(o_ref.dtype)


# ---------------------------------------------------------------------------
# Wrapper
# ---------------------------------------------------------------------------
def _pick_graphs_per_block(B, n, d, hphi, dpad,
                           vmem_budget_bytes=12 << 20, max_gpb=8):
    """Largest divisor g of B (capped) whose per-block VMEM footprint fits the
    budget: bigger g amortizes per-step overhead and feeds the MXU better."""
    per_graph_blocks = (n * d + d * hphi + n * n * n + n * dpad) * 4 * 2  # dbl buf
    scratch = 3 * n * n * hphi * 4                                        # pre/h1/tmp
    best = 1
    for g in range(1, min(B, max_gpb) + 1):
        if B % g == 0 and g * per_graph_blocks + scratch <= vmem_budget_bytes:
            best = g
    return best


def stable_expressive_pe(Lambda, V, edge_index, batch, params, n_per_graph):
    """Lambda:[B,D]  V:[N_sum,D]  edge_index:[2,E]  batch:[N_sum] -> [N_sum,D_pe]"""
    del batch  # equal-size graphs: nodes b*n .. (b+1)*n-1 belong to graph b
    # TODO(synk): variable-size graphs (torch_geometric.unbatch) would need a
    # scalar-prefetch offset table; here all graphs share the same node count.
    B, D = Lambda.shape
    n = n_per_graph
    (psi_w1, psi_b1, psi_w2, psi_b2,
     phi_w1, phi_b1, phi_w2, phi_b2) = params
    Hphi = phi_w1.shape[1]
    Dout = phi_w2.shape[1]

    # --- psi + G hoist in plain XLA (B*D*M is tiny) ---------------------------
    # Z[b,d,m] = psi_m(Lambda[b,d]);  G[b] = Z[b] @ phi_w1.
    t = Lambda[:, :, None, None] * psi_w1[None, None] + psi_b1[None, None]
    Z = (jnp.sum(jnp.maximum(t, 0.0) * psi_w2[None, None], axis=-1)
         + psi_b2[0][None, None, :])                                # [B, D, M]
    G = jnp.einsum('bdm,mh->bdh', Z, phi_w1)                        # [B, D, Hphi]

    # --- dense per-graph adjacency with self loops folded in (XLA glue) ------
    # A[b, i, j] = 1 iff edge j -> i; readout sums over in-neighbors j of i.
    src, dst = edge_index[0], edge_index[1]
    b_e = src // n
    A = jnp.zeros((B, n, n), jnp.float32).at[b_e, dst % n, src % n].set(1.0)
    A = A + jnp.eye(n, dtype=jnp.float32)[None]

    # Row-selector matrix for the in-kernel single-matmul neighbor sum:
    # S[b, i, i*n + j] = A[b, i, j]
    idx = jnp.arange(n)
    S = jnp.zeros((B, n, n, n), jnp.float32).at[:, idx, idx, :].set(A)
    S = S.reshape(B, n, n * n)                                      # [B, n, n*n]

    # --- pad the output projection to a lane-dense 128-wide block ------------
    Dpad = ((Dout + 127) // 128) * 128
    wp2_pad = jnp.zeros((Hphi, Dpad), jnp.float32).at[:, :Dout].set(phi_w2)
    bp2_pad = jnp.zeros((1, Dpad), jnp.float32).at[:, :Dout].set(phi_b2)

    gpb = _pick_graphs_per_block(B, n, D, Hphi, Dpad)
    grid = (B // gpb,)

    out = pl.pallas_call(
        spe_kernel,
        out_shape=jax.ShapeDtypeStruct((B * n, Dpad), jnp.float32),
        grid=grid,
        in_specs=[
            pl.BlockSpec((gpb * n, D), lambda g: (g, 0)),        # V rows
            pl.BlockSpec((gpb, D, Hphi), lambda g: (g, 0, 0)),   # G (hoisted)
            pl.BlockSpec((gpb, n, n * n), lambda g: (g, 0, 0)),  # S selector adj
            pl.BlockSpec((1, Hphi), lambda g: (0, 0)),           # phi bias 1
            pl.BlockSpec((Hphi, Dpad), lambda g: (0, 0)),        # phi W2 (padded)
            pl.BlockSpec((1, Dpad), lambda g: (0, 0)),           # phi bias 2 (padded)
        ],
        out_specs=pl.BlockSpec((gpb * n, Dpad), lambda g: (g, 0)),
        compiler_params=pltpu.CompilerParams(
            dimension_semantics=("parallel",),
            vmem_limit_bytes=48 * 1024 * 1024,
        ),
    )(V, G, S, phi_b1, wp2_pad, bp2_pad)

    return out[:, :Dout]


# ---------------------------------------------------------------------------
# Pure-JAX reference (same instantiation of psi / phi), for a sanity check.
# ---------------------------------------------------------------------------
def _reference(Lambda, V, edge_index, params, n):
    B, D = Lambda.shape
    (psi_w1, psi_b1, psi_w2, psi_b2,
     phi_w1, phi_b1, phi_w2, phi_b2) = params
    t = Lambda[:, :, None, None] * psi_w1[None, None] + psi_b1[None, None]
    Z = (jnp.sum(jnp.maximum(t, 0.0) * psi_w2[None, None], axis=-1)
         + psi_b2[0][None, None, :])                                # [B, D, M]
    src, dst = edge_index[0], edge_index[1]
    b_e = src // n
    A = jnp.zeros((B, n, n), jnp.float32).at[b_e, dst % n, src % n].set(1.0)
    A = A + jnp.eye(n, dtype=jnp.float32)[None]
    Vb = V.reshape(B, n, D)
    # W[b,i,j,m] = sum_d V[b,i,d] Z[b,d,m] V[b,j,d]
    W = jnp.einsum('bid,bdm,bjd->bijm', Vb, Z, Vb)
    h1 = jnp.maximum(jnp.einsum('bijm,mh->bijh', W, phi_w1) + phi_b1[0], 0.0)
    s = jnp.einsum('bij,bijh->bih', A, h1)
    out = jnp.einsum('bih,ho->bio', s, phi_w2) + phi_b2[0]
    return out.reshape(B * n, -1)


# ---------------------------------------------------------------------------
if __name__ == "__main__":
    B = 2          # graphs
    n = 8          # nodes per graph (equal-size assumption)
    D_pe = 8       # eigen dimension == phi.out_dims
    M = 4          # number of psi networks
    H_psi = 128    # psi hidden width
    H_phi = 128    # phi hidden width

    key = jax.random.PRNGKey(0)
    keys = jax.random.split(key, 12)

    # inputs
    Lambda = jax.random.normal(keys[0], (B, D_pe), jnp.float32)
    V = jax.random.normal(keys[1], (B * n, D_pe), jnp.float32)
    batch = jnp.repeat(jnp.arange(B, dtype=jnp.int32), n)
    # ring graph per batch element, both directions (global node indices)
    i = jnp.arange(n, dtype=jnp.int32)
    edges = []
    for b in range(B):
        s = b * n + i
        d = b * n + (i + 1) % n
        edges.append(jnp.stack([s, d]))
        edges.append(jnp.stack([d, s]))
    edge_index = jnp.concatenate(edges, axis=1)          # [2, 2*B*n]

    # deterministic parameters
    psi_w1 = 0.1 * jax.random.normal(keys[2], (M, H_psi), jnp.float32)
    psi_b1 = 0.1 * jax.random.normal(keys[3], (M, H_psi), jnp.float32)
    psi_w2 = 0.1 * jax.random.normal(keys[4], (M, H_psi), jnp.float32)
    psi_b2 = 0.1 * jax.random.normal(keys[5], (1, M), jnp.float32)
    phi_w1 = 0.1 * jax.random.normal(keys[6], (M, H_phi), jnp.float32)
    phi_b1 = 0.1 * jax.random.normal(keys[7], (1, H_phi), jnp.float32)
    phi_w2 = 0.1 * jax.random.normal(keys[8], (H_phi, D_pe), jnp.float32)
    phi_b2 = 0.1 * jax.random.normal(keys[9], (1, D_pe), jnp.float32)
    params = (psi_w1, psi_b1, psi_w2, psi_b2,
              phi_w1, phi_b1, phi_w2, phi_b2)

    pe = stable_expressive_pe(Lambda, V, edge_index, batch, params, n)
    pe = jax.block_until_ready(pe)
    assert pe.shape == (B * n, D_pe) and pe.dtype == jnp.float32

    ref = jax.block_until_ready(_reference(Lambda, V, edge_index, params, n))
    # bf16 matmuls in the kernel vs f32 reference: loose tolerance.
    assert jnp.allclose(pe, ref, rtol=5e-2, atol=5e-2), float(jnp.max(jnp.abs(pe - ref)))

    print("KERNEL_OK")
</pallas_src>

<mosaic_0001>
module attributes {stable_mosaic.version = 11 : i64} {
  func.func @spe_kernel(%arg0: i32, %arg1: memref<16x8xf32, #tpu.memory_space<vmem>>, %arg2: memref<2x8x128xf32, #tpu.memory_space<vmem>>, %arg3: memref<2x8x64xf32, #tpu.memory_space<vmem>>, %arg4: memref<1x128xf32, #tpu.memory_space<vmem>>, %arg5: memref<128x128xf32, #tpu.memory_space<vmem>>, %arg6: memref<1x128xf32, #tpu.memory_space<vmem>>, %arg7: memref<16x128xf32, #tpu.memory_space<vmem>>) attributes {dimension_semantics = [#tpu.dimension_semantics<parallel>], iteration_bounds = array<i64: 1>, scalar_prefetch = 0 : i64, scratch_operands = 0 : i64, tpu.core_type = #tpu.core_type<tc>, window_params = [{transform_indices = @transform_0, window_bounds = array<i64: 16, 8>}, {transform_indices = @transform_1, window_bounds = array<i64: 2, 8, 128>}, {transform_indices = @transform_2, window_bounds = array<i64: 2, 8, 64>}, {pipeline_mode = #tpu.pipeline_mode<synchronous>, transform_indices = @transform_3, window_bounds = array<i64: 1, 128>}, {pipeline_mode = #tpu.pipeline_mode<synchronous>, transform_indices = @transform_4, window_bounds = array<i64: 128, 128>}, {pipeline_mode = #tpu.pipeline_mode<synchronous>, transform_indices = @transform_5, window_bounds = array<i64: 1, 128>}, {transform_indices = @transform_6, window_bounds = array<i64: 16, 128>}]} {
    %c0 = arith.constant 0 : index
    %c0_0 = arith.constant 0 : index
    %0 = vector.load %arg4[%c0, %c0_0] : memref<1x128xf32, #tpu.memory_space<vmem>>, vector<1x128xf32>
    %c0_1 = arith.constant 0 : index
    %c0_2 = arith.constant 0 : index
    %1 = vector.load %arg6[%c0_1, %c0_2] : memref<1x128xf32, #tpu.memory_space<vmem>>, vector<1x128xf32>
    %c0_3 = arith.constant 0 : index
    %c0_4 = arith.constant 0 : index
    %2 = vector.load %arg5[%c0_3, %c0_4] : memref<128x128xf32, #tpu.memory_space<vmem>>, vector<128x128xf32>
    %3 = arith.truncf %2 : vector<128x128xf32> to vector<128x128xbf16>
    %c0_5 = arith.constant 0 : index
    %c0_6 = arith.constant 0 : index
    %4 = vector.load %arg1[%c0_5, %c0_6] : memref<16x8xf32, #tpu.memory_space<vmem>>, vector<8x8xf32>
    %c0_7 = arith.constant 0 : index
    %c0_8 = arith.constant 0 : index
    %c0_9 = arith.constant 0 : index
    %5 = vector.load %arg2[%c0_7, %c0_8, %c0_9] : memref<2x8x128xf32, #tpu.memory_space<vmem>>, vector<1x8x128xf32>
    %6 = vector.shape_cast %5 : vector<1x8x128xf32> to vector<8x128xf32>
    %7 = arith.truncf %6 : vector<8x128xf32> to vector<8x128xbf16>
    %c0_10 = arith.constant 0 : index
    %c0_11 = arith.constant 0 : index
    %c0_12 = arith.constant 0 : index
    %8 = vector.load %arg3[%c0_10, %c0_11, %c0_12] : memref<2x8x64xf32, #tpu.memory_space<vmem>>, vector<1x8x64xf32>
    %9 = vector.shape_cast %8 : vector<1x8x64xf32> to vector<8x64xf32>
    %10 = arith.truncf %9 : vector<8x64xf32> to vector<8x64xbf16>
    %11 = vector.shape_cast %4 : vector<8x8xf32> to vector<8x1x8xf32>
    %12 = vector.shape_cast %4 : vector<8x8xf32> to vector<1x8x8xf32>
    %13 = vector.broadcast %11 : vector<8x1x8xf32> to vector<8x8x8xf32>
    %14 = vector.broadcast %12 : vector<1x8x8xf32> to vector<8x8x8xf32>
    %15 = arith.mulf %13, %14 : vector<8x8x8xf32>
    %16 = vector.shape_cast %15 : vector<8x8x8xf32> to vector<64x8xf32>
    %17 = arith.truncf %16 : vector<64x8xf32> to vector<64x8xbf16>
    %cst = arith.constant dense<0.000000e+00> : vector<64x128xf32>
    %18 = tpu.matmul %17, %7, %cst {dimension_numbers = #tpu.dot_dimension_numbers<[1], [0], [0], [1], [0, 0, 1, 1], [], []>} : vector<64x8xbf16>, vector<8x128xbf16>, vector<64x128xf32> -> vector<64x128xf32>
    %19 = vector.broadcast %0 : vector<1x128xf32> to vector<64x128xf32>
    %20 = arith.addf %18, %19 : vector<64x128xf32>
    %cst_13 = arith.constant 0.000000e+00 : f32
    %21 = vector.broadcast %cst_13 : f32 to vector<64x128xf32>
    %22 = arith.maximumf %20, %21 : vector<64x128xf32>
    %23 = arith.truncf %22 : vector<64x128xf32> to vector<64x128xbf16>
    %cst_14 = arith.constant dense<0.000000e+00> : vector<8x128xf32>
    %24 = tpu.matmul %10, %23, %cst_14 {dimension_numbers = #tpu.dot_dimension_numbers<[1], [0], [0], [1], [0, 0, 1, 1], [], []>} : vector<8x64xbf16>, vector<64x128xbf16>, vector<8x128xf32> -> vector<8x128xf32>
    %25 = arith.truncf %24 : vector<8x128xf32> to vector<8x128xbf16>
    %cst_15 = arith.constant dense<0.000000e+00> : vector<8x128xf32>
    %26 = tpu.matmul %25, %3, %cst_15 {dimension_numbers = #tpu.dot_dimension_numbers<[1], [0], [0], [1], [0, 0, 1, 1], [], []>} : vector<8x128xbf16>, vector<128x128xbf16>, vector<8x128xf32> -> vector<8x128xf32>
    %27 = vector.broadcast %1 : vector<1x128xf32> to vector<8x128xf32>
    %28 = arith.addf %26, %27 : vector<8x128xf32>
    %c0_16 = arith.constant 0 : index
    %c0_17 = arith.constant 0 : index
    %29 = vector.load %arg7[%c0_16, %c0_17] : memref<16x128xf32, #tpu.memory_space<vmem>>, vector<8x128xf32>
    tpu.vector_store %arg7[%c0_16, %c0_17], %28 {strides = array<i32>} : memref<16x128xf32, #tpu.memory_space<vmem>>, vector<8x128xf32>,
    %c8 = arith.constant 8 : index
    %c0_18 = arith.constant 0 : index
    %30 = vector.load %arg1[%c8, %c0_18] : memref<16x8xf32, #tpu.memory_space<vmem>>, vector<8x8xf32>
    %c1 = arith.constant 1 : index
    %c0_19 = arith.constant 0 : index
    %c0_20 = arith.constant 0 : index
    %31 = vector.load %arg2[%c1, %c0_19, %c0_20] : memref<2x8x128xf32, #tpu.memory_space<vmem>>, vector<1x8x128xf32>
    %32 = vector.shape_cast %31 : vector<1x8x128xf32> to vector<8x128xf32>
    %33 = arith.truncf %32 : vector<8x128xf32> to vector<8x128xbf16>
    %c1_21 = arith.constant 1 : index
    %c0_22 = arith.constant 0 : index
    %c0_23 = arith.constant 0 : index
    %34 = vector.load %arg3[%c1_21, %c0_22, %c0_23] : memref<2x8x64xf32, #tpu.memory_space<vmem>>, vector<1x8x64xf32>
    %35 = vector.shape_cast %34 : vector<1x8x64xf32> to vector<8x64xf32>
    %36 = arith.truncf %35 : vector<8x64xf32> to vector<8x64xbf16>
    %37 = vector.shape_cast %30 : vector<8x8xf32> to vector<8x1x8xf32>
    %38 = vector.shape_cast %30 : vector<8x8xf32> to vector<1x8x8xf32>
    %39 = vector.broadcast %37 : vector<8x1x8xf32> to vector<8x8x8xf32>
    %40 = vector.broadcast %38 : vector<1x8x8xf32> to vector<8x8x8xf32>
    %41 = arith.mulf %39, %40 : vector<8x8x8xf32>
    %42 = vector.shape_cast %41 : vector<8x8x8xf32> to vector<64x8xf32>
    %43 = arith.truncf %42 : vector<64x8xf32> to vector<64x8xbf16>
    %cst_24 = arith.constant dense<0.000000e+00> : vector<64x128xf32>
    %44 = tpu.matmul %43, %33, %cst_24 {dimension_numbers = #tpu.dot_dimension_numbers<[1], [0], [0], [1], [0, 0, 1, 1], [], []>} : vector<64x8xbf16>, vector<8x128xbf16>, vector<64x128xf32> -> vector<64x128xf32>
    %45 = vector.broadcast %0 : vector<1x128xf32> to vector<64x128xf32>
    %46 = arith.addf %44, %45 : vector<64x128xf32>
    %cst_25 = arith.constant 0.000000e+00 : f32
    %47 = vector.broadcast %cst_25 : f32 to vector<64x128xf32>
    %48 = arith.maximumf %46, %47 : vector<64x128xf32>
    %49 = arith.truncf %48 : vector<64x128xf32> to vector<64x128xbf16>
    %cst_26 = arith.constant dense<0.000000e+00> : vector<8x128xf32>
    %50 = tpu.matmul %36, %49, %cst_26 {dimension_numbers = #tpu.dot_dimension_numbers<[1], [0], [0], [1], [0, 0, 1, 1], [], []>} : vector<8x64xbf16>, vector<64x128xbf16>, vector<8x128xf32> -> vector<8x128xf32>
    %51 = arith.truncf %50 : vector<8x128xf32> to vector<8x128xbf16>
    %cst_27 = arith.constant dense<0.000000e+00> : vector<8x128xf32>
    %52 = tpu.matmul %51, %3, %cst_27 {dimension_numbers = #tpu.dot_dimension_numbers<[1], [0], [0], [1], [0, 0, 1, 1], [], []>} : vector<8x128xbf16>, vector<128x128xbf16>, vector<8x128xf32> -> vector<8x128xf32>
    %53 = vector.broadcast %1 : vector<1x128xf32> to vector<8x128xf32>
    %54 = arith.addf %52, %53 : vector<8x128xf32>
    %c8_28 = arith.constant 8 : index
    %c0_29 = arith.constant 0 : index
    %55 = vector.load %arg7[%c8_28, %c0_29] : memref<16x128xf32, #tpu.memory_space<vmem>>, vector<8x128xf32>
    tpu.vector_store %arg7[%c8_28, %c0_29], %54 {strides = array<i32>} : memref<16x128xf32, #tpu.memory_space<vmem>>, vector<8x128xf32>,
    return
  }
  func.func @transform_0(%arg0: i32) -> (i32, i32) {
    %c0_i32 = arith.constant 0 : i32
    %c0_i32_0 = arith.constant 0 : i32
    return %arg0, %c0_i32 : i32, i32
  }
  func.func @transform_1(%arg0: i32) -> (i32, i32, i32) {
    %c0_i32 = arith.constant 0 : i32
    %c0_i32_0 = arith.constant 0 : i32
    %c0_i32_1 = arith.constant 0 : i32
    return %arg0, %c0_i32, %c0_i32_0 : i32, i32, i32
  }
  func.func @transform_2(%arg0: i32) -> (i32, i32, i32) {
    %c0_i32 = arith.constant 0 : i32
    %c0_i32_0 = arith.constant 0 : i32
    %c0_i32_1 = arith.constant 0 : i32
    return %arg0, %c0_i32, %c0_i32_0 : i32, i32, i32
  }
  func.func @transform_3(%arg0: i32) -> (i32, i32) {
    %c0_i32 = arith.constant 0 : i32
    %c0_i32_0 = arith.constant 0 : i32
    %c0_i32_1 = arith.constant 0 : i32
    return %c0_i32, %c0_i32_0 : i32, i32
  }
  func.func @transform_4(%arg0: i32) -> (i32, i32) {
    %c0_i32 = arith.constant 0 : i32
    %c0_i32_0 = arith.constant 0 : i32
    %c0_i32_1 = arith.constant 0 : i32
    return %c0_i32, %c0_i32_0 : i32, i32
  }
  func.func @transform_5(%arg0: i32) -> (i32, i32) {
    %c0_i32 = arith.constant 0 : i32
    %c0_i32_0 = arith.constant 0 : i32
    %c0_i32_1 = arith.constant 0 : i32
    return %c0_i32, %c0_i32_0 : i32, i32
  }
  func.func @transform_6(%arg0: i32) -> (i32, i32) {
    %c0_i32 = arith.constant 0 : i32
    %c0_i32_0 = arith.constant 0 : i32
    return %arg0, %c0_i32 : i32, i32
  }
}

</mosaic_0001>

<bundles_post_ra>
// kernel: tpu_custom_call.1
= control target key start
LH: loop header
LB: loop body
LE: loop exit
PB: predicated region body
PF: predicated region fallthrough
CT: control target
= control target key end

     0   :  { %11 = vsyncpa [#allocation3], 0  ;;  %s1144_s0 = inlined_call_operand.vmem [shape: f32[16,8], index: 0, kind: input, shape index: {}]   ;;  %s1145_s1 = inlined_call_operand.vmem [shape: f32[2,8,128], index: 1, kind: input, shape index: {}]   ;;  %s1146_s2 = inlined_call_operand.hbm [shape: f32[2,8,64], index: 2, kind: input, shape index: {}]   ;;  %s1147_s3 = inlined_call_operand.vmem [shape: f32[1,128], index: 3, kind: input, shape index: {}]   ;;  %s1148_s4 = inlined_call_operand.hbm [shape: f32[128,128], index: 4, kind: input, shape index: {}]   ;;  %s1149_s5 = inlined_call_operand.vmem [shape: f32[1,128], index: 5, kind: input, shape index: {}]   ;;  %s1150_s6 = inlined_call_operand.hbm [shape: f32[16,128], index: 6, kind: output, shape index: {}]  }
   0x1   :  { %12 = vsyncpa [#allocation6], 0 }
   0x2   :  { %13 = vsyncpa [#allocation4], 0  ;;  %s901_s21 = smov [#allocation2]   ;;  %s829_s25 = scalar_lea.hbm %s1146_s2, 256 }
   0x3   :  { %s23_s22 = sshll.u32 %s901_s21, 4  ;;  %p830_p0 = scmp.ne.s32.totalorder %s1146_s2, %s829_s25  ;;  %s24_s22 = int_to_ptr.vmem [resolvable:$true] %s23_s22 }
   0x4   :  { %p833_p1 = scmp.lt.u32.totalorder %s829_s25, %s1146_s2 }
   0x6   :  { %p835_p2 = pnand %p833_p1, %p830_p0 }
   0x8   :  { %838 = shalt.err (!%p835_p2)
}
   0x9   :  { %s839_s30 = scalar_lea.vmem %s24_s22, 256  ;;  %p844_p4 = scmp.lt.s32.totalorder %s24_s22, %s24_s22 }
   0xa   :  { %p840_p3 = scmp.ne.s32.totalorder %s24_s22, %s839_s30  ;;  %p845_p5 = scmp.lt.s32.totalorder %s839_s30, %s839_s30 }
   0xc   :  { %p846_p6 = por %p845_p5, %p844_p4 }
   0xe   :  { %p847_p7 = pnand %p846_p6, %p840_p3 }
  0x10   :  { %850 = shalt.err (!%p847_p7)
}
  0x11   :  { %s902_s7 = smov 128   ;;  %s903_s8 = smov 8  }
  0x12   :  { %29 = dma.hbm_to_vmem [thread:$0]  %s1146_s2, 256, %s24_s22, [#allocation3], %s902_s7, %s902_s7, %s903_s8  }
  0x13   :  { %s904_s11 = smov [#allocation5]   ;;  %s851_s15 = scalar_lea.hbm %s1148_s4, 2048 }
  0x14   :  { %s37_s12 = sshll.u32 %s904_s11, 4  ;;  %p852_p8 = scmp.ne.s32.totalorder %s1148_s4, %s851_s15  ;;  %s38_s12 = int_to_ptr.vmem [resolvable:$true] %s37_s12 }
  0x15   :  { %p855_p9 = scmp.lt.u32.totalorder %s851_s15, %s1148_s4 }
  0x17   :  { %p857_p10 = pnand %p855_p9, %p852_p8 }
  0x19   :  { %860 = shalt.err (!%p857_p10)
}
  0x1a   :  { %s861_s20 = scalar_lea.vmem %s38_s12, 2048  ;;  %p866_p12 = scmp.lt.s32.totalorder %s38_s12, %s38_s12 }
  0x1b   :  { %p862_p11 = scmp.ne.s32.totalorder %s38_s12, %s861_s20  ;;  %p867_p13 = scmp.lt.s32.totalorder %s861_s20, %s861_s20 }
  0x1d   :  { %p868_p0 = por %p867_p13, %p866_p12 }
  0x1f   :  { %p869_p1 = pnand %p868_p0, %p862_p11 }
  0x21   :  { %872 = shalt.err (!%p869_p1)
}
  0x22   :  { %43 = dma.hbm_to_vmem [thread:$0]  %s1148_s4, 2048, %s38_s12, [#allocation6], %s902_s7, %s902_s7, %s903_s8  }
  0x23   :  { %895 = dma.done.wait [#allocation3], 256  }
  0x24   :  { %896 = vsyncadd [#allocation3], 4294967040 }
  0x25   :  { %897 = dma.done.wait [#allocation6], 2048  }
  0x26   :  { %898 = vsyncadd [#allocation6], 4294965248  ;;  %v89_v0 = vlaneseq  ;;  %v905_v1 = vmov 1966171168   ;;  %v80_v6 = vld [vmem:[%s1145_s1] sm:$0xff]  ;;  %vm205_vm0 = vcmask 1043456  }
  0x27   :  { %v87_v2 = vunpack.c.l.s4 %v905_v1  ;;  %v79_v7 = vld [vmem:[%s1144_s0] sm:$0xff]  ;;  %v81_v8 = vpack.c.bf16 %v80_v6, %v80_v6  ;;  %vm192_vm1 = vcmask 64512   ;;  %v906_v44 = vmov 0.0   ;;  %v56_v46 = vld [vmem:[#allocation5 + $0x8] sm:$0xff]  ;;  %v57_v47 = vld [vmem:[#allocation5 + $0x10] sm:$0xff]  ;;  %s908_s30 = smov [#allocation7]  }
  0x28   :  { %v90_v3 = vshrl.u32 %v89_v0, 7  ;;  %v85_v11 = vcombine.high %v79_v7, %v79_v7  ;;  %755 = vmatprep.subr.bf16.mxu0 %v906_v44  ;;  %vm907_vm2 = vmmov 0   ;;  %v55_v45 = vld [vmem:[#allocation5] sm:$0xff]  ;;  %v58_v49 = vld [vmem:[#allocation5 + $0x18] sm:$0xff]  ;;  %v60_v52 = vld [vmem:[#allocation5 + $0x28] sm:$0xff]  ;;  %vm286_vm3 = vcmask 523264  }
  0x29   :  { %v88_v4 = vunpack.c.0.s8 %v87_v2  ;;  %817 = vmatprep.subr.msk.bf16.mxu1 %vm205_vm0, %v81_v8  ;;  %v207_v12 = vsel %vm205_vm0, %v81_v8, 0  ;;  %771 = vmatprep.mubr.msk.bf16.mxu0 %vm907_vm2, %v906_v44  ;;  %v1010_v48 = vpack.c.bf16 %v56_v46, %v55_v45  ;;  %v1013_v50 = vpack.c.bf16 %v58_v49, %v57_v47  ;;  %v59_v51 = vld [vmem:[#allocation5 + $0x20] sm:$0xff]  ;;  %v61_v54 = vld [vmem:[#allocation5 + $0x30] sm:$0xff]  ;;  %v62_v55 = vld [vmem:[#allocation5 + $0x38] sm:$0xff]  ;;  %s669_s9 = sshll.u32 %s908_s30, 4  ;;  %s670_s9 = int_to_ptr.vmem [resolvable:$true] %s669_s9 }
  0x2a   :  { %v983_v10 = vsub.s32 0, %v90_v3  ;;  %734 = vmatpush3.bf16.msra.mxu1 %v207_v12  ;;  %v1017_v53 = vpack.c.bf16 %v60_v52, %v59_v51  ;;  %v1021_v56 = vpack.c.bf16 %v62_v55, %v61_v54  ;;  %v63_v57 = vld [vmem:[#allocation5 + $0x40] sm:$0xff]  ;;  %v64_v58 = vld [vmem:[#allocation5 + $0x48] sm:$0xff]  ;;  %v65_v60 = vld [vmem:[#allocation5 + $0x50] sm:$0xff]  ;;  %p878_p3 = scmp.lt.s32.totalorder %s670_s9, %s670_s9 }
  0x2b   :  { %v974_v5 = vsub.s32 %v88_v4, %v90_v3  ;;  %743 = vmatprep.subr.bf16.mxu1 %v906_v44  ;;  %756 = vmatpush3.bf16.msra.mxu0 %v1010_v48  ;;  %v1025_v59 = vpack.c.bf16 %v64_v58, %v63_v57  ;;  %v66_v61 = vld [vmem:[#allocation5 + $0x58] sm:$0xff]  ;;  %v67_v63 = vld [vmem:[#allocation5 + $0x60] sm:$0xff]  ;;  %v68_v0 = vld [vmem:[#allocation5 + $0x68] sm:$0xff] }
  0x2c   :  { %757 = vmatprep.subr.bf16.mxu0 %v906_v44  ;;  %v1029_v62 = vpack.c.bf16 %v66_v61, %v65_v60  ;;  %v1033_v1 = vpack.c.bf16 %v68_v0, %v67_v63  ;;  %v1041_v2 = vld [vmem:[%s1147_s3] ss:$0 sm:$0xff]  ;;  %v1046_v3 = vld [vmem:[%s1144_s0 + $0x8] sm:$0xff]  ;;  %v82_v47 = vld [vmem:[#allocation2] sm:$0xff] }
  0x2d   :  { %v92_v9 = vrot.slane %v79_v7, %v974_v5  ;;  %v99_v15 = vrot.slane %v85_v11, %v974_v5  ;;  %v393_v11 = vrot.slane %v1046_v3, %v974_v5  ;;  %v83_v57 = vpack.c.bf16 %v82_v47, %v82_v47 }
  0x2f   :  { %v100_v13 = vcombine.high %v92_v9, %v92_v9  ;;  %v108_v14 = vrot.slane %v92_v9, %v974_v5  ;;  %v101_v19 = vcombine.high %v99_v15, %v99_v15  ;;  %v115_v20 = vrot.slane %v99_v15, %v974_v5  ;;  %758 = vmatpush3.bf16.msra.mxu0 %v1013_v50 }
  0x30   :  { %759 = vmatprep.subr.bf16.mxu0 %v906_v44 }
  0x31   :  { %v122_v16 = vrot.slane %v100_v13, %v974_v5  ;;  %v130_v17 = vcombine.high %v108_v14, %v108_v14  ;;  %v137_v18 = vrot.slane %v108_v14, %v983_v10  ;;  %v129_v25 = vrot.slane %v101_v19, %v974_v5 }
  0x32   :  { %v153_v26 = vrot.slane %v115_v20, %v983_v10  ;;  %v131_v27 = vcombine.high %v115_v20, %v115_v20  ;;  %v401_v19 = vcombine.high %v393_v11, %v393_v11  ;;  %v386_v20 = vcombine.high %v1046_v3, %v1046_v3 }
  0x33   :  { %v132_v21 = vcombine.high %v122_v16, %v122_v16  ;;  %v141_v22 = vrot.slane %v122_v16, %v983_v10  ;;  %v174_v23 = vmul.f32 %v137_v18, %v79_v7  ;;  %v145_v24 = vrot.slane %v130_v17, %v983_v10  ;;  %760 = vmatpush3.bf16.msra.mxu0 %v1017_v53 }
  0x34   :  { %v157_v31 = vrot.slane %v129_v25, %v983_v10  ;;  %v178_v32 = vmul.f32 %v153_v26, %v79_v7  ;;  %v133_v33 = vcombine.high %v129_v25, %v129_v25  ;;  %v161_v36 = vrot.slane %v131_v27, %v983_v10  ;;  %761 = vmatprep.subr.bf16.mxu0 %v906_v44 }
  0x35   :  { %v175_v28 = vmul.f32 %v141_v22, %v79_v7  ;;  %v149_v29 = vrot.slane %v132_v21, %v983_v10  ;;  %v176_v30 = vmul.f32 %v145_v24, %v79_v7  ;;  %v409_v26 = vrot.slane %v393_v11, %v974_v5 }
  0x36   :  { %v179_v37 = vmul.f32 %v157_v31, %v79_v7  ;;  %v165_v38 = vrot.slane %v133_v33, %v983_v10  ;;  %v180_v41 = vmul.f32 %v161_v36, %v79_v7 }
  0x37   :  { %v182_v34 = vpack.c.bf16 %v175_v28, %v174_v23  ;;  %v177_v35 = vmul.f32 %v149_v29, %v79_v7  ;;  %762 = vmatpush3.bf16.msra.mxu0 %v1021_v56  ;;  %v423_v29 = vrot.slane %v401_v19, %v974_v5  ;;  %v438_v36 = vrot.slane %v409_v26, %v983_v10  ;;  %v69_v19 = vld [vmem:[#allocation5 + $0x70] sm:$0xff] }
  0x38   :  { %v184_v40 = vpack.c.bf16 %v179_v37, %v178_v32  ;;  %v181_v42 = vmul.f32 %v165_v38, %v79_v7  ;;  %763 = vmatprep.subr.bf16.mxu0 %v906_v44  ;;  %v431_v45 = vcombine.high %v409_v26, %v409_v26 }
  0x39   :  { %735 = vmatprep.mubr.msk.bf16.mxu1 %vm192_vm1, %v182_v34  ;;  %v183_v39 = vpack.c.bf16 %v177_v35, %v176_v30  ;;  %v400_v30 = vrot.slane %v386_v20, %v974_v5  ;;  %v433_v46 = vcombine.high %v423_v29, %v423_v29  ;;  %v475_v49 = vmul.f32 %v438_v36, %v1046_v3  ;;  %v70_v20 = vld [vmem:[#allocation5 + $0x78] sm:$0xff] }
  0x3a   :  { %v185_v43 = vpack.c.bf16 %v181_v42, %v180_v41  ;;  %v446_v58 = vrot.slane %v431_v45, %v983_v10 }
  0x3b   :  { %736 = vmatmul.mubr.msk.bf16.vlgmr.msra.gmra.mrb[0].mxu1 %vm192_vm1, %v183_v39  ;;  %764 = vmatpush3.bf16.msra.mxu0 %v1025_v59  ;;  %v442_v39 = vrot.slane %v423_v29, %v983_v10  ;;  %v416_v52 = vrot.slane %v400_v30, %v974_v5  ;;  %v450_v60 = vrot.slane %v433_v46, %v983_v10 }
  0x3c   :  { %739 = vmatprep.mubr.msk.bf16.mxu1 %vm192_vm1, %v184_v40  ;;  %765 = vmatprep.subr.bf16.mxu0 %v906_v44  ;;  %v402_v40 = vcombine.high %v400_v30, %v400_v30 }
  0x3d   :  { %v476_v51 = vmul.f32 %v442_v39, %v1046_v3  ;;  %v454_v63 = vrot.slane %v416_v52, %v983_v10 }
  0x3e   :  { %v430_v54 = vrot.slane %v402_v40, %v974_v5  ;;  %v477_v5 = vmul.f32 %v446_v58, %v1046_v3 }
  0x3f   :  { %766 = vmatpush3.bf16.msra.mxu0 %v1029_v62  ;;  %v483_v61 = vpack.c.bf16 %v476_v51, %v475_v49 }
  0x40   :  { %767 = vmatprep.subr.bf16.mxu0 %v906_v44  ;;  %v458_v0 = vrot.slane %v430_v54, %v983_v10 }
  0x42   :  { %v480_v11 = vmul.f32 %v458_v0, %v1046_v3 }
  0x43   :  { %740 = vmatmul.mubr.msk.bf16.gmra.mrb[4].mxu1 %vm192_vm1, %v185_v43  ;;  %768 = vmatpush3.bf16.msra.mxu0 %v1033_v1  ;;  %v689_v43 = vld [vmem:[%s1145_s1 + $0x8] sm:$0xff] }
  0x44   :  { %751 = vmatprep.mubr.msk.bf16.mxu1 %vm907_vm2, %v906_v44  ;;  %769 = vmatprep.subr.bf16.mxu0 %v906_v44  ;;  %v381_v55 = vpack.c.bf16 %v689_v43, %v689_v43 }
 0x10e   :  { %v737_v4 = vpop.f32.mrb[0].mxu1 }
 0x10f   :  { %v252_v6 = vadd.f32 %v737_v4, %v1041_v2  ;;  %v243_v7 = vpop.f32.mrb[1].mxu1  ;;  %v500_v4 = vsel %vm205_vm0, %v381_v55, 0 }
 0x110   :  { %v244_v8 = vadd.f32 %v1041_v2, %v243_v7  ;;  %v738_v9 = vpop.f32.mrb[2].mxu1  ;;  %v432_v7 = vcombine.high %v416_v52, %v416_v52  ;;  %v383_v52 = vld [vmem:[#allocation2 + $0x8] sm:$0xff] }
 0x111   :  { %v255_v12 = vadd.f32 %v738_v9, %v1041_v2  ;;  %v246_v13 = vpop.f32.mrb[3].mxu1  ;;  %v276_v15 = vmax.f32 %v252_v6, 0.0  ;;  %v478_v6 = vmul.f32 %v450_v60, %v1046_v3  ;;  %v479_v9 = vmul.f32 %v454_v63, %v1046_v3 }
 0x112   :  { %v247_v14 = vadd.f32 %v1041_v2, %v246_v13  ;;  %v274_v17 = vmax.f32 %v244_v8, 0.0  ;;  %v434_v8 = vcombine.high %v430_v54, %v430_v54  ;;  %v462_v13 = vrot.slane %v432_v7, %v983_v10 }
 0x113   :  { %v277_v16 = vmax.f32 %v255_v12, 0.0  ;;  %v484_v12 = vpack.c.bf16 %v478_v6, %v477_v5 }
 0x114   :  { %v275_v18 = vmax.f32 %v247_v14, 0.0  ;;  %v466_v14 = vrot.slane %v434_v8, %v983_v10 }
 0x115   :  { %v283_v21 = vpack.c.bf16 %v277_v16, %v276_v15  ;;  %v485_v15 = vpack.c.bf16 %v480_v11, %v479_v9  ;;  %v481_v16 = vmul.f32 %v462_v13, %v1046_v3 }
 0x116   :  { %v282_v22 = vpack.c.bf16 %v275_v18, %v274_v17  ;;  %v741_v23 = vpop.f32.mrb[4].mxu1  ;;  %v482_v17 = vmul.f32 %v466_v14, %v1046_v3 }
 0x117   :  { %v268_v24 = vadd.f32 %v741_v23, %v1041_v2  ;;  %v259_v25 = vpop.f32.mrb[5].mxu1 }
 0x118   :  { %v260_v27 = vadd.f32 %v1041_v2, %v259_v25  ;;  %v742_v28 = vpop.f32.mrb[6].mxu1  ;;  %744 = vmatpush3.bf16.msra.mxu1 %v282_v22  ;;  %v486_v18 = vpack.c.bf16 %v482_v17, %v481_v16 }
 0x119   :  { %v271_v31 = vadd.f32 %v742_v28, %v1041_v2  ;;  %v262_v32 = vpop.f32.mrb[7].mxu1  ;;  %745 = vmatprep.subr.bf16.mxu1 %v906_v44  ;;  %v280_v34 = vmax.f32 %v268_v24, 0.0 }
 0x11a   :  { %v263_v33 = vadd.f32 %v1041_v2, %v262_v32  ;;  %v278_v37 = vmax.f32 %v260_v27, 0.0 }
 0x11b   :  { %v281_v35 = vmax.f32 %v271_v31, 0.0 }
 0x11c   :  { %v279_v38 = vmax.f32 %v263_v33, 0.0  ;;  %746 = vmatpush3.bf16.msra.mxu1 %v283_v21  ;;  %v78_v21 = vpack.c.bf16 %v70_v20, %v69_v19 }
 0x11d   :  { %v285_v41 = vpack.c.bf16 %v281_v35, %v280_v34  ;;  %747 = vmatprep.subr.bf16.mxu1 %v906_v44 }
 0x11e   :  { %v284_v42 = vpack.c.bf16 %v279_v38, %v278_v37  ;;  %770 = vmatpush3.bf16.msra.mxu0 %v78_v21 }
 0x11f   :  { %797 = vmatprep.subr.bf16.mxu0 %v906_v44 }
 0x120   :  { %748 = vmatpush3.bf16.msra.mxu1 %v284_v42 }
 0x121   :  { %749 = vmatprep.subr.bf16.mxu1 %v906_v44 }
 0x124   :  { %750 = vmatpush3.bf16.msra.mxu1 %v285_v41 }
 0x125   :  { %818 = vmatprep.subr.msk.bf16.mxu1 %vm205_vm0, %v381_v55 }
 0x127   :  { %752 = vmatmul.mubr.msk.bf16.vlgmr.msra.gmra.mrb[8].mxu1 %vm286_vm3, %v83_v57 }
 0x128   :  { %776 = vmatpush3.bf16.msra.mxu1 %v500_v4  ;;  %777 = vmatprep.mubr.msk.bf16.mxu1 %vm192_vm1, %v483_v61 }
 0x129   :  { %785 = vmatprep.subr.bf16.mxu1 %v906_v44 }
 0x12f   :  { %778 = vmatmul.mubr.msk.bf16.vlgmr.msra.gmra.mrb[12].mxu1 %vm192_vm1, %v484_v12 }
 0x130   :  { %781 = vmatprep.mubr.msk.bf16.mxu1 %vm192_vm1, %v485_v15 }
 0x137   :  { %782 = vmatmul.mubr.msk.bf16.gmra.mrb[16].mxu1 %vm192_vm1, %v486_v18 }
 0x138   :  { %793 = vmatprep.mubr.msk.bf16.mxu1 %vm907_vm2, %v906_v44 }
 0x1fa   :  { %v324_v10 = vpop.f32.mrb[8].mxu1 }
 0x1fb   :  { %v330_v22 = vpack.c.bf16 %v324_v10, %v324_v10  ;;  %v753_v23 = vpop.f32.mrb[9].mxu1 }
 0x1fc   :  { %v327_v24 = vpop.f32.mrb[10].mxu1 }
 0x1fd   :  { %v754_v25 = vpop.f32.mrb[11].mxu1  ;;  %772 = vmatmul.mubr.bf16.vlgmr.msra.gmra.mrb[0].mxu0 %v330_v22 }
 0x1fe   :  { %798 = vmatpush3.bf16.msra.mxu0 %v1010_v48  ;;  %813 = vmatprep.mubr.msk.bf16.mxu0 %vm907_vm2, %v906_v44 }
 0x1ff   :  { %799 = vmatprep.subr.bf16.mxu0 %v906_v44 }
 0x202   :  { %v779_v3 = vpop.f32.mrb[12].mxu1  ;;  %800 = vmatpush3.bf16.msra.mxu0 %v1013_v50 }
 0x203   :  { %v545_v26 = vadd.f32 %v779_v3, %v1041_v2  ;;  %v536_v27 = vpop.f32.mrb[13].mxu1  ;;  %801 = vmatprep.subr.bf16.mxu0 %v906_v44 }
 0x204   :  { %v537_v28 = vadd.f32 %v1041_v2, %v536_v27  ;;  %v780_v29 = vpop.f32.mrb[14].mxu1 }
 0x205   :  { %v548_v30 = vadd.f32 %v780_v29, %v1041_v2  ;;  %v539_v31 = vpop.f32.mrb[15].mxu1  ;;  %v569_v32 = vmax.f32 %v545_v26, 0.0 }
 0x206   :  { %v540_v48 = vadd.f32 %v1041_v2, %v539_v31  ;;  %802 = vmatpush3.bf16.msra.mxu0 %v1017_v53  ;;  %v567_v50 = vmax.f32 %v537_v28, 0.0 }
 0x207   :  { %v570_v33 = vmax.f32 %v548_v30, 0.0  ;;  %803 = vmatprep.subr.bf16.mxu0 %v906_v44 }
 0x208   :  { %v568_v34 = vmax.f32 %v540_v48, 0.0 }
 0x209   :  { %v576_v35 = vpack.c.bf16 %v570_v33, %v569_v32 }
 0x20a   :  { %v575_v36 = vpack.c.bf16 %v568_v34, %v567_v50  ;;  %v783_v37 = vpop.f32.mrb[16].mxu1  ;;  %804 = vmatpush3.bf16.msra.mxu0 %v1021_v56 }
 0x20b   :  { %v561_v38 = vadd.f32 %v783_v37, %v1041_v2  ;;  %v552_v39 = vpop.f32.mrb[17].mxu1  ;;  %805 = vmatprep.subr.bf16.mxu0 %v906_v44 }
 0x20c   :  { %v553_v40 = vadd.f32 %v1041_v2, %v552_v39  ;;  %v784_v41 = vpop.f32.mrb[18].mxu1  ;;  %786 = vmatpush3.bf16.msra.mxu1 %v575_v36 }
 0x20d   :  { %v564_v53 = vadd.f32 %v784_v41, %v1041_v2  ;;  %v555_v42 = vpop.f32.mrb[19].mxu1  ;;  %787 = vmatprep.subr.bf16.mxu1 %v906_v44  ;;  %v573_v45 = vmax.f32 %v561_v38, 0.0 }
 0x20e   :  { %v556_v43 = vadd.f32 %v1041_v2, %v555_v42  ;;  %806 = vmatpush3.bf16.msra.mxu0 %v1025_v59  ;;  %v571_v46 = vmax.f32 %v553_v40, 0.0  ;;  %v384_v59 = vpack.c.bf16 %v383_v52, %v383_v52  ;;  %v688_v2 = vld [vmem:[%s1149_s5] ss:$0 sm:$0xff]  ;;  %s873_s5 = scalar_lea.vmem %s670_s9, 256 }
 0x20f   :  { %v574_v56 = vmax.f32 %v564_v53, 0.0  ;;  %807 = vmatprep.subr.bf16.mxu0 %v906_v44  ;;  %p874_p2 = scmp.ne.s32.totalorder %s670_s9, %s873_s5  ;;  %p879_p4 = scmp.lt.s32.totalorder %s873_s5, %s873_s5 }
 0x210   :  { %v572_v47 = vmax.f32 %v556_v43, 0.0  ;;  %788 = vmatpush3.bf16.msra.mxu1 %v576_v35 }
 0x211   :  { %v578_v49 = vpack.c.bf16 %v574_v56, %v573_v45  ;;  %789 = vmatprep.subr.bf16.mxu1 %v906_v44  ;;  %p880_p5 = por %p879_p4, %p878_p3 }
 0x212   :  { %v577_v51 = vpack.c.bf16 %v572_v47, %v571_v46  ;;  %808 = vmatpush3.bf16.msra.mxu0 %v1029_v62 }
 0x213   :  { %809 = vmatprep.subr.bf16.mxu0 %v906_v44  ;;  %p881_p6 = pnand %p880_p5, %p874_p2 }
 0x214   :  { %790 = vmatpush3.bf16.msra.mxu1 %v577_v51 }
 0x215   :  { %791 = vmatprep.subr.bf16.mxu1 %v906_v44 }
 0x216   :  { %810 = vmatpush3.bf16.msra.mxu0 %v1033_v1 }
 0x217   :  { %811 = vmatprep.subr.bf16.mxu0 %v906_v44 }
 0x218   :  { %792 = vmatpush3.bf16.msra.mxu1 %v578_v49 }
 0x21a   :  { %812 = vmatpush3.bf16.msra.mxu0 %v78_v21 }
 0x21b   :  { %794 = vmatmul.mubr.msk.bf16.vlgmr.msra.gmra.mrb[20].mxu1 %vm286_vm3, %v384_v59 }
 0x2d0   :  { %v371_v62 = vpop.f32.mrb[0].mxu0 }
 0x2d1   :  { %v372_v54 = vadd.f32 %v688_v2, %v371_v62  ;;  %v773_v55 = vpop.f32.mrb[1].mxu0 }
 0x2d2   :  { %v374_v57 = vpop.f32.mrb[2].mxu0 }
 0x2d3   :  { %377 = vst [vmem:[#allocation7] sm:$0xff] %v372_v54  ;;  %v774_v58 = vpop.f32.mrb[3].mxu0 }
 0x2ee   :  { %v616_v60 = vpop.f32.mrb[20].mxu1 }
 0x2ef   :  { %v622_v61 = vpack.c.bf16 %v616_v60, %v616_v60  ;;  %v795_v1 = vpop.f32.mrb[21].mxu1 }
 0x2f0   :  { %v619_v63 = vpop.f32.mrb[22].mxu1 }
 0x2f1   :  { %v796_v0 = vpop.f32.mrb[23].mxu1  ;;  %814 = vmatmul.mubr.bf16.vlgmr.msra.gmra.mrb[4].mxu0 %v622_v61 }
 0x3c4   :  { %v657_v44 = vpop.f32.mrb[4].mxu0 }
 0x3c5   :  { %v658_v4 = vadd.f32 %v688_v2, %v657_v44  ;;  %v815_v5 = vpop.f32.mrb[5].mxu0 }
 0x3c6   :  { %v660_v6 = vpop.f32.mrb[6].mxu0 }
 0x3c7   :  { %663 = vst [vmem:[#allocation7 + $0x8] sm:$0xff] %v658_v4  ;;  %v816_v7 = vpop.f32.mrb[7].mxu0 }
 0x3c8   :  { %884 = shalt.err (!%p881_p6)
}
 0x3c9   :  { %s885_s12 = scalar_lea.hbm %s1150_s6, 256 }
 0x3ca   :  { %p886_p7 = scmp.ne.s32.totalorder %s1150_s6, %s885_s12  ;;  %p889_p8 = scmp.lt.u32.totalorder %s885_s12, %s1150_s6 }
 0x3cc   :  { %p891_p9 = pnand %p889_p8, %p886_p7 }
 0x3ce   :  { %894 = shalt.err (!%p891_p9)
}
 0x3cf   :  { %675 = dma.vmem_to_hbm [thread:$0]  %s670_s9, 256, %s1150_s6, [#allocation4], %s902_s7, %s902_s7, %s903_s8  }
 0x3d0   :  { %899 = dma.done.wait [#allocation4], 256  }
 0x3d1   :  { %900 = vsyncadd [#allocation4], 4294967040 }
 0x3d2   :  { %679 = vsyncpa [#allocation3], 1 }
 0x3d3   :  { %680 = vsyncpa [#allocation6], 1 }
 0x3d4   :  { %681 = vsyncpa [#allocation4], 1 }

</bundles_post_ra>
